<compile_context>
chip_gen: v7x
topology: tpu7x:2x2x1
jax: 0.10.0
libtpu: 0.0.40
codegen_flags: <defaults>
</compile_context>

<pallas_src>
import numpy as np
import jax
import jax.numpy as jnp
from jax.experimental import pallas as pl
from jax.experimental.pallas import tpu as pltpu

LAMBDA = 0.5  # param_shrink = 1 / n, n = 2 blocks


# ----------------------------------------------------------------------------
# Host-side wavelet matrix construction (numpy, compile-time constants)
# ----------------------------------------------------------------------------
def wavelet_matrices(h, size):
    """(size/2, size) downsampled circular-convolution analysis matrices (lo, hi)."""
    h = np.asarray(h, dtype=np.float64)
    L = len(h)
    g = np.array([((-1.0) ** j) * h[L - 1 - j] for j in range(L)])  # QMF highpass
    half = size // 2
    glo = np.zeros((half, size), np.float64)
    ghi = np.zeros((half, size), np.float64)
    for k in range(half):
        for j in range(L):
            glo[k, (2 * k + j) % size] += h[j]
            ghi[k, (2 * k + j) % size] += g[j]
    return glo, ghi


def db1_filter():
    a = 1.0 / np.sqrt(2.0)
    return [a, a]


def db2_filter():
    s3 = np.sqrt(3.0)
    d = 4.0 * np.sqrt(2.0)
    return [(1.0 + s3) / d, (3.0 + s3) / d, (3.0 - s3) / d, (1.0 - s3) / d]


def analysis_matrix(filt, h, w):
    """(h*w, h*w) 2-D DWT matrix: vec(subbands) = A @ vec(x) (row-major vec).

    Rows 0:hw/4 = LL, then LH, HL, HH.  Orthonormal -> IDWT matrix is A.T.
    """
    gh_lo, gh_hi = wavelet_matrices(filt, h)   # row (H-axis) transform
    gw_lo, gw_hi = wavelet_matrices(filt, w)   # column (W-axis) transform
    a = np.concatenate([np.kron(gh_lo, gw_lo),
                        np.kron(gh_lo, gw_hi),
                        np.kron(gh_hi, gw_lo),
                        np.kron(gh_hi, gw_hi)], axis=0)
    return a  # float64, (h*w, h*w)


def _round_up(a, m):
    return (a + m - 1) // m * m


def _cdiv(a, b):
    return -(-a // b)


# ----------------------------------------------------------------------------
# Kernel
# ----------------------------------------------------------------------------
def _softshrink(x, lam):
    # x - clip(x, -lam, lam): 3 VPU ops/elem instead of two nested selects.
    return x - jnp.clip(x, -lam, lam)


def sr_kernel(wsum_ref, x_ref, at_ref, s_ref, o_ref):
    f32 = jnp.float32
    x = x_ref[...]                                                   # (TB, HW) f32
    xb = x.astype(jnp.bfloat16)

    # Fused analysis of both wavelet blocks: (TB, HW) @ (HW, 2*HW) on the MXU.
    pre = jnp.dot(xb, at_ref[...], preferred_element_type=f32)       # (TB, 2HW) f32
    alpha = _softshrink(pre, LAMBDA)

    # Fused weighted synthesis: (TB, 2*HW) @ (2*HW, HW).
    rec = jnp.dot(alpha.astype(jnp.bfloat16), s_ref[...],
                  preferred_element_type=f32)                        # (TB, HW) f32

    # Fused residual: w0*(rec1 - x) + w1*(rec2 - x) = rec - (w0 + w1) * x
    o_ref[...] = rec - wsum_ref[0] * x


# ----------------------------------------------------------------------------
# Wrapper
# ----------------------------------------------------------------------------
def super_resolve(x_nchw, block_params, weight_params):
    """x_nchw: (N, C, H, W) f32; block_params: (2, 4) f32; weight_params: (2, 1) f32."""
    n, c, h, w = x_nchw.shape
    assert h % 2 == 0 and w % 2 == 0
    hw = h * w
    hw4 = hw // 4
    b = n * c

    if hw > 1024:
        # Kronecker-form weights grow as hw^2 and overflow v7x VMEM; use the
        # separable pure-JAX path for big images.
        # TODO(synk): write a separable (per-axis factor) Pallas kernel for large H*W.
        return super_resolve_ref(x_nchw, block_params, weight_params)

    x2d = x_nchw.reshape(b, hw).astype(jnp.float32)                  # lane-dense layout

    # Structural transform matrices are compile-time numpy constants.
    a1 = jnp.asarray(analysis_matrix(db1_filter(), h, w), jnp.float32)   # (hw, hw)
    a2 = jnp.asarray(analysis_matrix(db2_filter(), h, w), jnp.float32)

    # Fold per-subband shrink params into the analysis matrices, the mix
    # weights into the synthesis matrices, and fuse both blocks into one
    # analysis matrix AT (hw, 2hw) and one synthesis matrix S (2hw, hw).
    p1 = jnp.repeat(block_params[0].astype(jnp.float32), hw4)        # (hw,)
    p2 = jnp.repeat(block_params[1].astype(jnp.float32), hw4)
    w0 = weight_params[0, 0].astype(jnp.float32)
    w1 = weight_params[1, 0].astype(jnp.float32)
    at = jnp.concatenate([a1.T * p1[None, :], a2.T * p2[None, :]], axis=1)  # (hw, 2hw)
    s = jnp.concatenate([w0 * a1, w1 * a2], axis=0)                         # (2hw, hw)
    at_bf = at.astype(jnp.bfloat16)    # bf16 MXU operands, f32 accumulation
    s_bf = s.astype(jnp.bfloat16)
    wsum = jnp.reshape(w0 + w1, (1,))

    # Tiling: tb <= 512; once B >= 16 force an even number (>= 2) of grid steps
    # so both v7x TensorCores get work and the single-TC pipeline overlaps DMA.
    tb_cap = 512
    b8 = _round_up(b, 8)
    if b8 >= 16:
        num_steps = max(2, _cdiv(b8, tb_cap))
        num_steps += num_steps % 2            # even step count for 2-core split
    else:
        num_steps = 1
    tb = min(tb_cap, _round_up(_cdiv(b8, num_steps), 8))
    b_pad = tb * num_steps
    if b_pad != b:
        x2d = jnp.pad(x2d, ((0, b_pad - b), (0, 0)))

    out = pl.pallas_call(
        sr_kernel,
        out_shape=jax.ShapeDtypeStruct((b_pad, hw), jnp.float32),
        grid=(num_steps,),
        in_specs=[
            pl.BlockSpec(memory_space=pltpu.MemorySpace.SMEM),        # wsum (1,)
            pl.BlockSpec((tb, hw), lambda i: (i, 0)),                 # x tile (f32)
            pl.BlockSpec((hw, 2 * hw), lambda i: (0, 0),              # AT (bf16, constant)
                         pipeline_mode=pl.Buffered(1)),
            pl.BlockSpec((2 * hw, hw), lambda i: (0, 0),              # S  (bf16, constant)
                         pipeline_mode=pl.Buffered(1)),
        ],
        out_specs=pl.BlockSpec((tb, hw), lambda i: (i, 0)),
        compiler_params=pltpu.CompilerParams(
            dimension_semantics=("parallel",)),
        cost_estimate=pl.CostEstimate(
            flops=8 * b_pad * hw * hw,
            transcendentals=0,
            bytes_accessed=2 * b_pad * hw * 4 + 8 * hw * hw),
    )(wsum, x2d, at_bf, s_bf)

    return out[:b].reshape(n, c, h, w)


# ----------------------------------------------------------------------------
# Pure-JAX reference (independent separable form, explicit f32 precision).
# ----------------------------------------------------------------------------
def super_resolve_ref(x_nchw, block_params, weight_params):
    hi_prec = jax.lax.Precision.HIGHEST
    ein = lambda eq, a, b: jnp.einsum(eq, a, b, precision=hi_prec)
    n, c, h, w = x_nchw.shape
    x = x_nchw.reshape(n * c, h, w).astype(jnp.float32)
    deltas = []
    for bi, filt in enumerate([db1_filter(), db2_filter()]):
        gh_lo, gh_hi = [jnp.asarray(m, jnp.float32) for m in wavelet_matrices(filt, h)]
        gw_lo, gw_hi = [jnp.asarray(m, jnp.float32) for m in wavelet_matrices(filt, w)]
        p = block_params[bi].astype(jnp.float32)
        lo = ein('rh,bhw->brw', gh_lo, x)
        hi = ein('rh,bhw->brw', gh_hi, x)
        subs = [ein('brw,cw->brc', lo, gw_lo), ein('brw,cw->brc', lo, gw_hi),
                ein('brw,cw->brc', hi, gw_lo), ein('brw,cw->brc', hi, gw_hi)]
        shr = [_softshrink(p[k] * subs[k], LAMBDA) for k in range(4)]
        lo_rec = ein('brc,cw->brw', shr[0], gw_lo) + ein('brc,cw->brw', shr[1], gw_hi)
        hi_rec = ein('brc,cw->brw', shr[2], gw_lo) + ein('brc,cw->brw', shr[3], gw_hi)
        rec = ein('rh,brw->bhw', gh_lo, lo_rec) + ein('rh,brw->bhw', gh_hi, hi_rec)
        deltas.append(rec - x)
    d = jnp.einsum('bhwk,kj->bhwj', jnp.stack(deltas, axis=-1),
                   weight_params.astype(jnp.float32), precision=hi_prec)
    return d.reshape(n, c, h, w)


if __name__ == "__main__":
    key = jax.random.PRNGKey(0)
    k_x, k_p, k_w = jax.random.split(key, 3)

    N, C, H, W = 2, 4, 16, 16
    x = jax.random.normal(k_x, (N, C, H, W), dtype=jnp.float32)

    # torch.rand equivalents: uniform [0, 1).
    #   Block._param  -> (4,1,1,1,1) per block; flattened here to (2, 4)
    #   _weight_params -> (2, 1)
    block_params = jax.random.uniform(k_p, (2, 4), dtype=jnp.float32)
    weight_params = jax.random.uniform(k_w, (2, 1), dtype=jnp.float32)

    out = super_resolve(x, block_params, weight_params)
    out = jax.block_until_ready(out)

    ref = jax.block_until_ready(super_resolve_ref(x, block_params, weight_params))
    assert out.shape == x.shape
    # Tolerance relaxed vs the f32 version: the kernel feeds the MXU bf16
    # operands (f32 accumulation), per the performance review.
    np.testing.assert_allclose(np.asarray(out), np.asarray(ref), rtol=5e-2, atol=5e-2)

    print("KERNEL_OK")
</pallas_src>

<mosaic_0001>
module attributes {stable_mosaic.version = 11 : i64} {
  func.func @sr_kernel(%arg0: i32, %arg1: memref<1xf32, #tpu.memory_space<smem>>, %arg2: memref<8x256xf32, #tpu.memory_space<vmem>>, %arg3: memref<256x512xbf16, #tpu.memory_space<vmem>>, %arg4: memref<512x256xbf16, #tpu.memory_space<vmem>>, %arg5: memref<8x256xf32, #tpu.memory_space<vmem>>) attributes {dimension_semantics = [#tpu.dimension_semantics<parallel>], iteration_bounds = array<i64: 1>, scalar_prefetch = 0 : i64, scratch_operands = 0 : i64, tpu.core_type = #tpu.core_type<tc>, window_params = [{transform_indices = @transform_0, window_bounds = array<i64: 1>}, {transform_indices = @transform_1, window_bounds = array<i64: 8, 256>}, {pipeline_mode = #tpu.pipeline_mode<synchronous>, transform_indices = @transform_2, window_bounds = array<i64: 256, 512>}, {pipeline_mode = #tpu.pipeline_mode<synchronous>, transform_indices = @transform_3, window_bounds = array<i64: 512, 256>}, {transform_indices = @transform_4, window_bounds = array<i64: 8, 256>}]} {
    %c0 = arith.constant 0 : index
    %c0_0 = arith.constant 0 : index
    %0 = vector.load %arg2[%c0, %c0_0] : memref<8x256xf32, #tpu.memory_space<vmem>>, vector<8x256xf32>
    %1 = arith.truncf %0 : vector<8x256xf32> to vector<8x256xbf16>
    %c0_1 = arith.constant 0 : index
    %c0_2 = arith.constant 0 : index
    %2 = vector.load %arg3[%c0_1, %c0_2] : memref<256x512xbf16, #tpu.memory_space<vmem>>, vector<256x512xbf16>
    %cst = arith.constant dense<0.000000e+00> : vector<8x512xf32>
    %3 = tpu.matmul %1, %2, %cst {dimension_numbers = #tpu.dot_dimension_numbers<[1], [0], [0], [1], [0, 0, 1, 1], [], []>} : vector<8x256xbf16>, vector<256x512xbf16>, vector<8x512xf32> -> vector<8x512xf32>
    %cst_3 = arith.constant -5.000000e-01 : f32
    %cst_4 = arith.constant 5.000000e-01 : f32
    %4 = vector.broadcast %cst_3 : f32 to vector<8x512xf32>
    %5 = arith.maximumf %4, %3 : vector<8x512xf32>
    %6 = vector.broadcast %cst_4 : f32 to vector<8x512xf32>
    %7 = arith.minimumf %6, %5 : vector<8x512xf32>
    %8 = arith.subf %3, %7 : vector<8x512xf32>
    %9 = arith.truncf %8 : vector<8x512xf32> to vector<8x512xbf16>
    %c0_5 = arith.constant 0 : index
    %c0_6 = arith.constant 0 : index
    %10 = vector.load %arg4[%c0_5, %c0_6] : memref<512x256xbf16, #tpu.memory_space<vmem>>, vector<512x256xbf16>
    %cst_7 = arith.constant dense<0.000000e+00> : vector<8x256xf32>
    %11 = tpu.matmul %9, %10, %cst_7 {dimension_numbers = #tpu.dot_dimension_numbers<[1], [0], [0], [1], [0, 0, 1, 1], [], []>} : vector<8x512xbf16>, vector<512x256xbf16>, vector<8x256xf32> -> vector<8x256xf32>
    %c0_8 = arith.constant 0 : index
    %12 = memref.load %arg1[%c0_8] : memref<1xf32, #tpu.memory_space<smem>>
    %13 = vector.broadcast %12 : f32 to vector<8x256xf32>
    %14 = arith.mulf %13, %0 : vector<8x256xf32>
    %15 = arith.subf %11, %14 : vector<8x256xf32>
    %c0_9 = arith.constant 0 : index
    %c0_10 = arith.constant 0 : index
    %16 = vector.load %arg5[%c0_9, %c0_10] : memref<8x256xf32, #tpu.memory_space<vmem>>, vector<8x256xf32>
    tpu.vector_store %arg5[%c0_9, %c0_10], %15 {strides = array<i32>} : memref<8x256xf32, #tpu.memory_space<vmem>>, vector<8x256xf32>,
    return
  }
  func.func @transform_0(%arg0: i32) -> i32 {
    %c0_i32 = arith.constant 0 : i32
    %c0_i32_0 = arith.constant 0 : i32
    return %c0_i32 : i32
  }
  func.func @transform_1(%arg0: i32) -> (i32, i32) {
    %c0_i32 = arith.constant 0 : i32
    %c0_i32_0 = arith.constant 0 : i32
    return %arg0, %c0_i32 : i32, i32
  }
  func.func @transform_2(%arg0: i32) -> (i32, i32) {
    %c0_i32 = arith.constant 0 : i32
    %c0_i32_0 = arith.constant 0 : i32
    %c0_i32_1 = arith.constant 0 : i32
    return %c0_i32, %c0_i32_0 : i32, i32
  }
  func.func @transform_3(%arg0: i32) -> (i32, i32) {
    %c0_i32 = arith.constant 0 : i32
    %c0_i32_0 = arith.constant 0 : i32
    %c0_i32_1 = arith.constant 0 : i32
    return %c0_i32, %c0_i32_0 : i32, i32
  }
  func.func @transform_4(%arg0: i32) -> (i32, i32) {
    %c0_i32 = arith.constant 0 : i32
    %c0_i32_0 = arith.constant 0 : i32
    return %arg0, %c0_i32 : i32, i32
  }
}

</mosaic_0001>

<bundles_post_ra>
// kernel: tpu_custom_call.1
= control target key start
LH: loop header
LB: loop body
LE: loop exit
PB: predicated region body
PF: predicated region fallthrough
CT: control target
= control target key end

     0   :  { %10 = vsyncpa [#allocation4], 0  ;;  %s1566_s0 = inlined_call_operand.<no memory space> [shape: f32[1], index: 0, kind: input, shape index: {}]   ;;  %s1567_s1 = inlined_call_operand.hbm [shape: f32[8,256], index: 1, kind: input, shape index: {}]   ;;  %s1568_s2 = inlined_call_operand.hbm [shape: bf16[256,512], index: 2, kind: input, shape index: {}]   ;;  %s1569_s3 = inlined_call_operand.hbm [shape: bf16[512,256], index: 3, kind: input, shape index: {}]   ;;  %s1570_s4 = inlined_call_operand.hbm [shape: f32[8,256], index: 4, kind: output, shape index: {}]  }
   0x1   :  { %11 = vsyncpa [#allocation7], 0 }
   0x2   :  { %12 = vsyncpa [#allocation5], 0  ;;  %s1464_s15 = smov [#allocation6]   ;;  %s1370_s19 = scalar_lea.hbm %s1568_s2, 8192 }
   0x3   :  { %s30_s16 = sshll.u32 %s1464_s15, 4  ;;  %p1371_p0 = scmp.ne.s32.totalorder %s1568_s2, %s1370_s19  ;;  %s31_s16 = int_to_ptr.vmem [resolvable:$true] %s30_s16 }
   0x4   :  { %p1374_p1 = scmp.lt.u32.totalorder %s1370_s19, %s1568_s2 }
   0x6   :  { %p1376_p2 = pnand %p1374_p1, %p1371_p0 }
   0x8   :  { %1379 = shalt.err (!%p1376_p2)
}
   0x9   :  { %s1380_s24 = scalar_lea.vmem %s31_s16, 8192  ;;  %p1385_p4 = scmp.lt.s32.totalorder %s31_s16, %s31_s16 }
   0xa   :  { %p1381_p3 = scmp.ne.s32.totalorder %s31_s16, %s1380_s24  ;;  %p1386_p5 = scmp.lt.s32.totalorder %s1380_s24, %s1380_s24 }
   0xc   :  { %p1387_p6 = por %p1386_p5, %p1385_p4 }
   0xe   :  { %p1388_p7 = pnand %p1387_p6, %p1381_p3 }
  0x10   :  { %1391 = shalt.err (!%p1388_p7)
}
  0x11   :  { %s1465_s25 = smov 256   ;;  %s1466_s26 = smov 16  }
  0x12   :  { %36 = dma.hbm_to_vmem [thread:$0]  %s1568_s2, 8192, %s31_s16, [#allocation7], %s1465_s25, %s1465_s25, %s1466_s26  }
  0x13   :  { %s1467_s29 = smov [#allocation3]   ;;  %s1468_s5 = smov [#allocation8]  }
  0x14   :  { %s21_s30 = sshll.u32 %s1467_s29, 4  ;;  %s42_s6 = sshll.u32 %s1468_s5, 4  ;;  %s22_s30 = int_to_ptr.vmem [resolvable:$true] %s21_s30  ;;  %s43_s6 = int_to_ptr.vmem [resolvable:$true] %s42_s6 }
  0x15   :  { %s1392_s9 = scalar_lea.hbm %s1567_s1, 256 }
  0x16   :  { %p1393_p8 = scmp.ne.s32.totalorder %s1567_s1, %s1392_s9  ;;  %p1396_p9 = scmp.lt.u32.totalorder %s1392_s9, %s1567_s1 }
  0x18   :  { %p1398_p10 = pnand %p1396_p9, %p1393_p8 }
  0x1a   :  { %1401 = shalt.err (!%p1398_p10)
}
  0x1b   :  { %s1402_s2 = scalar_lea.vmem %s22_s30, 256  ;;  %p1407_p12 = scmp.lt.s32.totalorder %s22_s30, %s22_s30 }
  0x1c   :  { %p1403_p11 = scmp.ne.s32.totalorder %s22_s30, %s1402_s2  ;;  %p1408_p13 = scmp.lt.s32.totalorder %s1402_s2, %s1402_s2 }
  0x1e   :  { %p1409_p0 = por %p1408_p13, %p1407_p12 }
  0x20   :  { %p1410_p1 = pnand %p1409_p0, %p1403_p11 }
  0x22   :  { %1413 = shalt.err (!%p1410_p1)
}
  0x23   :  { %24 = dma.hbm_to_vmem [thread:$0]  %s1567_s1, 256, %s22_s30, [#allocation4]  }
  0x24   :  { %s1414_s18 = scalar_lea.hbm %s1569_s3, 8192 }
  0x25   :  { %p1415_p2 = scmp.ne.s32.totalorder %s1569_s3, %s1414_s18  ;;  %p1418_p3 = scmp.lt.u32.totalorder %s1414_s18, %s1569_s3 }
  0x27   :  { %p1420_p4 = pnand %p1418_p3, %p1415_p2 }
  0x29   :  { %1423 = shalt.err (!%p1420_p4)
}
  0x2a   :  { %s1424_s23 = scalar_lea.vmem %s43_s6, 8192  ;;  %p1429_p6 = scmp.lt.s32.totalorder %s43_s6, %s43_s6 }
  0x2b   :  { %p1425_p5 = scmp.ne.s32.totalorder %s43_s6, %s1424_s23  ;;  %p1430_p7 = scmp.lt.s32.totalorder %s1424_s23, %s1424_s23 }
  0x2d   :  { %p1431_p8 = por %p1430_p7, %p1429_p6 }
  0x2f   :  { %p1432_p9 = pnand %p1431_p8, %p1425_p5 }
  0x31   :  { %1435 = shalt.err (!%p1432_p9)
}
  0x32   :  { %s1469_s1 = smov 128   ;;  %s1470_s24 = smov 8  }
  0x33   :  { %48 = dma.hbm_to_vmem [thread:$0]  %s1569_s3, 8192, %s43_s6, [#allocation7], %s1469_s1, %s1469_s1, %s1470_s24  }
  0x34   :  { %1458 = dma.done.wait [#allocation4], 256  }
  0x35   :  { %1459 = vsyncadd [#allocation4], 4294967040 }
  0x36   :  { %1460 = dma.done.wait [#allocation7], 16384  }
  0x37   :  { %1461 = vsyncadd [#allocation7], 4294950912  ;;  %v1178_v0 = vld [vmem:[#allocation6 + $0x4] ss:$16 sps:$4 sm:$0xff]   ;;  %v1180_v1 = vld [vmem:[#allocation6] ss:$16 sps:$4 sm:$0xff]  }
  0x38   :  { %446 = vmatprep.subr.bf16.mxu1 %v1178_v0  ;;  %v1181_v2 = vld [vmem:[#allocation6 + $0x24] ss:$16 sps:$4 sm:$0xff]   ;;  %v1183_v3 = vld [vmem:[#allocation6 + $0x20] ss:$16 sps:$4 sm:$0xff]   ;;  %v1533_v13 = vld [vmem:[#allocation3 + $0x8] sm:$0xff]  ;;  %s1471_s28 = smov [#allocation9]  }
  0x39   :  { %447 = vmatpush1.bf16.msra.mxu1 %v1180_v1  ;;  %v1184_v4 = vld [vmem:[#allocation6 + $0x44] ss:$16 sps:$4 sm:$0xff]   ;;  %v1186_v5 = vld [vmem:[#allocation6 + $0x40] ss:$16 sps:$4 sm:$0xff]   ;;  %v1537_v14 = vpack.c.bf16 %v1533_v13, %v1533_v13  ;;  %v1228_v45 = vld [vmem:[#allocation6 + $0xc] ss:$16 sps:$4 sm:$0xff]  }
  0x3a   :  { %448 = vmatprep.subr.bf16.mxu1 %v1181_v2  ;;  %v1187_v6 = vld [vmem:[#allocation6 + $0x64] ss:$16 sps:$4 sm:$0xff]   ;;  %v1189_v7 = vld [vmem:[#allocation6 + $0x60] ss:$16 sps:$4 sm:$0xff]   ;;  %v1226_v47 = vld [vmem:[#allocation6 + $0x8] ss:$16 sps:$4 sm:$0xff]  }
  0x3b   :  { %v1190_v8 = vld [vmem:[#allocation6 + $0x84] ss:$16 sps:$4 sm:$0xff]   ;;  %v1192_v9 = vld [vmem:[#allocation6 + $0x80] ss:$16 sps:$4 sm:$0xff]   ;;  %478 = vmatprep.mubr.bf16.mxu1 %v1537_v14  ;;  %v1231_v49 = vld [vmem:[#allocation6 + $0x2c] ss:$16 sps:$4 sm:$0xff]  }
  0x3c   :  { %v1193_v10 = vld [vmem:[#allocation6 + $0xa4] ss:$16 sps:$4 sm:$0xff]   ;;  %v1195_v11 = vld [vmem:[#allocation6 + $0xa0] ss:$16 sps:$4 sm:$0xff]   ;;  %v1229_v52 = vld [vmem:[#allocation6 + $0x28] ss:$16 sps:$4 sm:$0xff]  }
  0x3d   :  { %449 = vmatpush1.bf16.msra.mxu1 %v1183_v3  ;;  %v1196_v12 = vld [vmem:[#allocation6 + $0xc4] ss:$16 sps:$4 sm:$0xff]   ;;  %v1198_v15 = vld [vmem:[#allocation6 + $0xc0] ss:$16 sps:$4 sm:$0xff]   ;;  %v1234_v53 = vld [vmem:[#allocation6 + $0x4c] ss:$16 sps:$4 sm:$0xff]  }
  0x3e   :  { %450 = vmatprep.subr.bf16.mxu1 %v1184_v4  ;;  %v1199_v16 = vld [vmem:[#allocation6 + $0xe4] ss:$16 sps:$4 sm:$0xff]   ;;  %v1201_v17 = vld [vmem:[#allocation6 + $0xe0] ss:$16 sps:$4 sm:$0xff]   ;;  %v1232_v56 = vld [vmem:[#allocation6 + $0x48] ss:$16 sps:$4 sm:$0xff]  }
  0x3f   :  { %v1202_v18 = vld [vmem:[#allocation6 + $0x104] ss:$16 sps:$4 sm:$0xff]   ;;  %v1204_v19 = vld [vmem:[#allocation6 + $0x100] ss:$16 sps:$4 sm:$0xff]   ;;  %v1237_v57 = vld [vmem:[#allocation6 + $0x6c] ss:$16 sps:$4 sm:$0xff]  }
  0x40   :  { %v1205_v20 = vld [vmem:[#allocation6 + $0x124] ss:$16 sps:$4 sm:$0xff]   ;;  %v1207_v21 = vld [vmem:[#allocation6 + $0x120] ss:$16 sps:$4 sm:$0xff]   ;;  %v1235_v60 = vld [vmem:[#allocation6 + $0x68] ss:$16 sps:$4 sm:$0xff]  }
  0x41   :  { %451 = vmatpush1.bf16.msra.mxu1 %v1186_v5  ;;  %v1208_v22 = vld [vmem:[#allocation6 + $0x144] ss:$16 sps:$4 sm:$0xff]   ;;  %v1210_v23 = vld [vmem:[#allocation6 + $0x140] ss:$16 sps:$4 sm:$0xff]   ;;  %v1240_v61 = vld [vmem:[#allocation6 + $0x8c] ss:$16 sps:$4 sm:$0xff]  }
  0x42   :  { %452 = vmatprep.subr.bf16.mxu1 %v1187_v6  ;;  %v1211_v24 = vld [vmem:[#allocation6 + $0x164] ss:$16 sps:$4 sm:$0xff]   ;;  %v1213_v25 = vld [vmem:[#allocation6 + $0x160] ss:$16 sps:$4 sm:$0xff]   ;;  %v1238_v0 = vld [vmem:[#allocation6 + $0x88] ss:$16 sps:$4 sm:$0xff]  }
  0x43   :  { %v1214_v26 = vld [vmem:[#allocation6 + $0x184] ss:$16 sps:$4 sm:$0xff]   ;;  %v1276_v28 = vld [vmem:[#allocation8] ss:$8 sps:$4 sm:$0xff]   ;;  %v1279_v31 = vld [vmem:[#allocation8 + $0x10] ss:$8 sps:$4 sm:$0xff]  }
  0x44   :  { %v1274_v27 = vld [vmem:[#allocation8 + $0x4] ss:$8 sps:$4 sm:$0xff]   ;;  %v1277_v29 = vld [vmem:[#allocation8 + $0x14] ss:$8 sps:$4 sm:$0xff]   ;;  %v1216_v30 = vld [vmem:[#allocation6 + $0x180] ss:$16 sps:$4 sm:$0xff]  }
  0x45   :  { %453 = vmatpush1.bf16.msra.mxu1 %v1189_v7  ;;  %928 = vmatprep.subr.bf16.mxu0 %v1274_v27  ;;  %v1217_v32 = vld [vmem:[#allocation6 + $0x1a4] ss:$16 sps:$4 sm:$0xff]   ;;  %v1219_v34 = vld [vmem:[#allocation6 + $0x1a0] ss:$16 sps:$4 sm:$0xff]   ;;  %v1243_v1 = vld [vmem:[#allocation6 + $0xac] ss:$16 sps:$4 sm:$0xff]  }
  0x46   :  { %454 = vmatprep.subr.bf16.mxu1 %v1190_v8  ;;  %929 = vmatpush1.bf16.msra.mxu0 %v1276_v28  ;;  %v1280_v33 = vld [vmem:[#allocation8 + $0x24] ss:$8 sps:$4 sm:$0xff]   ;;  %v1282_v35 = vld [vmem:[#allocation8 + $0x20] ss:$8 sps:$4 sm:$0xff]   ;;  %v1283_v37 = vld [vmem:[#allocation8 + $0x34] ss:$8 sps:$4 sm:$0xff]  }
  0x47   :  { %930 = vmatprep.subr.bf16.mxu0 %v1277_v29  ;;  %v1220_v36 = vld [vmem:[#allocation6 + $0x1c4] ss:$16 sps:$4 sm:$0xff]   ;;  %v1222_v38 = vld [vmem:[#allocation6 + $0x1c0] ss:$16 sps:$4 sm:$0xff]   ;;  %v1241_v4 = vld [vmem:[#allocation6 + $0xa8] ss:$16 sps:$4 sm:$0xff]  }
  0x48   :  { %v1285_v39 = vld [vmem:[#allocation8 + $0x30] ss:$8 sps:$4 sm:$0xff]   ;;  %v1223_v40 = vld [vmem:[#allocation6 + $0x1e4] ss:$16 sps:$4 sm:$0xff]   ;;  %v1288_v44 = vld [vmem:[#allocation8 + $0x40] ss:$8 sps:$4 sm:$0xff]  }
  0x49   :  { %455 = vmatpush1.bf16.msra.mxu1 %v1192_v9  ;;  %v1286_v41 = vld [vmem:[#allocation8 + $0x44] ss:$8 sps:$4 sm:$0xff]   ;;  %v1225_v42 = vld [vmem:[#allocation6 + $0x1e0] ss:$16 sps:$4 sm:$0xff]   ;;  %v1289_v46 = vld [vmem:[#allocation8 + $0x54] ss:$8 sps:$4 sm:$0xff]  }
  0x4a   :  { %456 = vmatprep.subr.bf16.mxu1 %v1193_v10  ;;  %931 = vmatpush1.bf16.msra.mxu0 %v1279_v31  ;;  %v1540_v43 = vld [vmem:[#allocation3] sm:$0xff]  ;;  %v1292_v51 = vld [vmem:[#allocation8 + $0x64] ss:$8 sps:$4 sm:$0xff]   ;;  %v1294_v54 = vld [vmem:[#allocation8 + $0x60] ss:$8 sps:$4 sm:$0xff]   ;;  %s1024_s29 = sshll.u32 %s1471_s28, 4  ;;  %s1025_s29 = int_to_ptr.vmem [resolvable:$true] %s1024_s29 }
  0x4b   :  { %932 = vmatprep.subr.bf16.mxu0 %v1280_v33  ;;  %v1544_v48 = vpack.c.bf16 %v1540_v43, %v1540_v43  ;;  %v1291_v50 = vld [vmem:[#allocation8 + $0x50] ss:$8 sps:$4 sm:$0xff]   ;;  %v1295_v55 = vld [vmem:[#allocation8 + $0x74] ss:$8 sps:$4 sm:$0xff]   ;;  %v1298_v59 = vld [vmem:[#allocation8 + $0x84] ss:$8 sps:$4 sm:$0xff]   ;;  %p1441_p11 = scmp.lt.s32.totalorder %s1025_s29, %s1025_s29 }
  0x4c   :  { %v1297_v58 = vld [vmem:[#allocation8 + $0x70] ss:$8 sps:$4 sm:$0xff]   ;;  %v1300_v62 = vld [vmem:[#allocation8 + $0x80] ss:$8 sps:$4 sm:$0xff]   ;;  %v1301_v63 = vld [vmem:[#allocation8 + $0x94] ss:$8 sps:$4 sm:$0xff]  }
  0x4d   :  { %457 = vmatpush1.bf16.msra.mxu1 %v1195_v11  ;;  %v1303_v2 = vld [vmem:[#allocation8 + $0x90] ss:$8 sps:$4 sm:$0xff]   ;;  %v1304_v3 = vld [vmem:[#allocation8 + $0xa4] ss:$8 sps:$4 sm:$0xff]   ;;  %v1306_v6 = vld [vmem:[#allocation8 + $0xa0] ss:$8 sps:$4 sm:$0xff]  }
  0x4e   :  { %458 = vmatprep.subr.bf16.mxu1 %v1196_v12  ;;  %933 = vmatpush1.bf16.msra.mxu0 %v1282_v35  ;;  %v1246_v5 = vld [vmem:[#allocation6 + $0xcc] ss:$16 sps:$4 sm:$0xff]   ;;  %v1244_v8 = vld [vmem:[#allocation6 + $0xc8] ss:$16 sps:$4 sm:$0xff]   ;;  %s1436_s30 = scalar_lea.vmem %s1025_s29, 256 }
  0x4f   :  { %934 = vmatprep.subr.bf16.mxu0 %v1283_v37  ;;  %v1307_v7 = vld [vmem:[#allocation8 + $0xb4] ss:$8 sps:$4 sm:$0xff]   ;;  %v1309_v10 = vld [vmem:[#allocation8 + $0xb0] ss:$8 sps:$4 sm:$0xff]   ;;  %v1310_v11 = vld [vmem:[#allocation8 + $0xc4] ss:$8 sps:$4 sm:$0xff]   ;;  %p1437_p10 = scmp.ne.s32.totalorder %s1025_s29, %s1436_s30  ;;  %p1442_p12 = scmp.lt.s32.totalorder %s1436_s30, %s1436_s30 }
  0x50   :  { %v1249_v9 = vld [vmem:[#allocation6 + $0xec] ss:$16 sps:$4 sm:$0xff]   ;;  %v1247_v12 = vld [vmem:[#allocation6 + $0xe8] ss:$16 sps:$4 sm:$0xff]  }
  0x51   :  { %459 = vmatpush1.bf16.msra.mxu1 %v1198_v15  ;;  %v1312_v15 = vld [vmem:[#allocation8 + $0xc0] ss:$8 sps:$4 sm:$0xff]   ;;  %v1267_v27 = vld [vmem:[#allocation6 + $0x1ac] ss:$16 sps:$4 sm:$0xff]   ;;  %p1443_p13 = por %p1442_p12, %p1441_p11 }
  0x52   :  { %460 = vmatprep.subr.bf16.mxu1 %v1199_v16  ;;  %935 = vmatpush1.bf16.msra.mxu0 %v1285_v39  ;;  %v1313_v16 = vld [vmem:[#allocation8 + $0xd4] ss:$8 sps:$4 sm:$0xff]   ;;  %v1265_v28 = vld [vmem:[#allocation6 + $0x1a8] ss:$16 sps:$4 sm:$0xff]   ;;  %v1316_v33 = vld [vmem:[#allocation8 + $0xe4] ss:$8 sps:$4 sm:$0xff]  }
  0x53   :  { %936 = vmatprep.subr.bf16.mxu0 %v1286_v41  ;;  %v1270_v29 = vld [vmem:[#allocation6 + $0x1cc] ss:$16 sps:$4 sm:$0xff]   ;;  %p1444_p0 = pnand %p1443_p13, %p1437_p10 }
  0x54   :  { %v1273_v31 = vld [vmem:[#allocation6 + $0x1ec] ss:$16 sps:$4 sm:$0xff]  }
  0x55   :  { %461 = vmatpush1.bf16.msra.mxu1 %v1201_v17  ;;  %v1250_v17 = vld [vmem:[#allocation6 + $0x108] ss:$16 sps:$4 sm:$0xff]   ;;  %v1319_v35 = vld [vmem:[#allocation8 + $0xf4] ss:$8 sps:$4 sm:$0xff]   ;;  %v1324_v37 = vld [vmem:[#allocation8 + $0x104] ss:$8 sps:$4 sm:$0xff]  }
  0x56   :  { %462 = vmatprep.subr.bf16.mxu1 %v1202_v18  ;;  %937 = vmatpush1.bf16.msra.mxu0 %v1288_v44  ;;  %v1255_v18 = vld [vmem:[#allocation6 + $0x12c] ss:$16 sps:$4 sm:$0xff]  }
  0x57   :  { %938 = vmatprep.subr.bf16.mxu0 %v1289_v46 }
  0x59   :  { %463 = vmatpush1.bf16.msra.mxu1 %v1204_v19  ;;  %v1315_v19 = vld [vmem:[#allocation8 + $0xd0] ss:$8 sps:$4 sm:$0xff]  }
  0x5a   :  { %464 = vmatprep.subr.bf16.mxu1 %v1205_v20  ;;  %939 = vmatpush1.bf16.msra.mxu0 %v1291_v50  ;;  %v1253_v20 = vld [vmem:[#allocation6 + $0x128] ss:$16 sps:$4 sm:$0xff]   ;;  %v1327_v50 = vld [vmem:[#allocation8 + $0x114] ss:$8 sps:$4 sm:$0xff]  }
  0x5b   :  { %940 = vmatprep.subr.bf16.mxu0 %v1292_v51  ;;  %v1325_v51 = vld [vmem:[#allocation8 + $0x110] ss:$8 sps:$4 sm:$0xff]  }
  0x5d   :  { %465 = vmatpush1.bf16.msra.mxu1 %v1207_v21  ;;  %v1258_v21 = vld [vmem:[#allocation6 + $0x14c] ss:$16 sps:$4 sm:$0xff]  }
  0x5e   :  { %466 = vmatprep.subr.bf16.mxu1 %v1208_v22  ;;  %941 = vmatpush1.bf16.msra.mxu0 %v1294_v54  ;;  %v1256_v22 = vld [vmem:[#allocation6 + $0x148] ss:$16 sps:$4 sm:$0xff]   ;;  %v1333_v54 = vld [vmem:[#allocation8 + $0x134] ss:$8 sps:$4 sm:$0xff]  }
  0x5f   :  { %942 = vmatprep.subr.bf16.mxu0 %v1295_v55  ;;  %v1331_v55 = vld [vmem:[#allocation8 + $0x130] ss:$8 sps:$4 sm:$0xff]  }
  0x61   :  { %467 = vmatpush1.bf16.msra.mxu1 %v1210_v23  ;;  %v1261_v23 = vld [vmem:[#allocation6 + $0x16c] ss:$16 sps:$4 sm:$0xff]  }
  0x62   :  { %468 = vmatprep.subr.bf16.mxu1 %v1211_v24  ;;  %943 = vmatpush1.bf16.msra.mxu0 %v1297_v58  ;;  %v1259_v24 = vld [vmem:[#allocation6 + $0x168] ss:$16 sps:$4 sm:$0xff]   ;;  %v1339_v58 = vld [vmem:[#allocation8 + $0x154] ss:$8 sps:$4 sm:$0xff]  }
  0x63   :  { %944 = vmatprep.subr.bf16.mxu0 %v1298_v59  ;;  %v1337_v59 = vld [vmem:[#allocation8 + $0x150] ss:$8 sps:$4 sm:$0xff]  }
  0x65   :  { %469 = vmatpush1.bf16.msra.mxu1 %v1213_v25  ;;  %v1264_v25 = vld [vmem:[#allocation6 + $0x18c] ss:$16 sps:$4 sm:$0xff]  }
  0x66   :  { %470 = vmatprep.subr.bf16.mxu1 %v1214_v26  ;;  %945 = vmatpush1.bf16.msra.mxu0 %v1300_v62  ;;  %v1262_v26 = vld [vmem:[#allocation6 + $0x188] ss:$16 sps:$4 sm:$0xff]   ;;  %v1345_v62 = vld [vmem:[#allocation8 + $0x174] ss:$8 sps:$4 sm:$0xff]  }
  0x67   :  { %946 = vmatprep.subr.bf16.mxu0 %v1301_v63  ;;  %v1343_v63 = vld [vmem:[#allocation8 + $0x170] ss:$8 sps:$4 sm:$0xff]  }
  0x69   :  { %471 = vmatpush1.bf16.msra.mxu1 %v1216_v30  ;;  %v1268_v30 = vld [vmem:[#allocation6 + $0x1c8] ss:$16 sps:$4 sm:$0xff]  }
  0x6a   :  { %472 = vmatprep.subr.bf16.mxu1 %v1217_v32  ;;  %947 = vmatpush1.bf16.msra.mxu0 %v1303_v2  ;;  %v1271_v32 = vld [vmem:[#allocation6 + $0x1e8] ss:$16 sps:$4 sm:$0xff]   ;;  %v1351_v2 = vld [vmem:[#allocation8 + $0x194] ss:$8 sps:$4 sm:$0xff]  }
  0x6b   :  { %948 = vmatprep.subr.bf16.mxu0 %v1304_v3  ;;  %v1349_v3 = vld [vmem:[#allocation8 + $0x190] ss:$8 sps:$4 sm:$0xff]  }
  0x6d   :  { %473 = vmatpush1.bf16.msra.mxu1 %v1219_v34  ;;  %v1318_v34 = vld [vmem:[#allocation8 + $0xe0] ss:$8 sps:$4 sm:$0xff]  }
  0x6e   :  { %474 = vmatprep.subr.bf16.mxu1 %v1220_v36  ;;  %949 = vmatpush1.bf16.msra.mxu0 %v1306_v6  ;;  %v1321_v36 = vld [vmem:[#allocation8 + $0xf0] ss:$8 sps:$4 sm:$0xff]   ;;  %v1357_v6 = vld [vmem:[#allocation8 + $0x1b4] ss:$8 sps:$4 sm:$0xff]  }
  0x6f   :  { %950 = vmatprep.subr.bf16.mxu0 %v1307_v7  ;;  %v1355_v7 = vld [vmem:[#allocation8 + $0x1b0] ss:$8 sps:$4 sm:$0xff]  }
  0x71   :  { %475 = vmatpush1.bf16.msra.mxu1 %v1222_v38 }
  0x72   :  { %476 = vmatprep.subr.bf16.mxu1 %v1223_v40  ;;  %951 = vmatpush1.bf16.msra.mxu0 %v1309_v10  ;;  %v1363_v10 = vld [vmem:[#allocation8 + $0x1d4] ss:$8 sps:$4 sm:$0xff]  }
  0x73   :  { %952 = vmatprep.subr.bf16.mxu0 %v1310_v11  ;;  %v1361_v11 = vld [vmem:[#allocation8 + $0x1d0] ss:$8 sps:$4 sm:$0xff]  }
  0x75   :  { %477 = vmatpush1.bf16.msra.mxu1 %v1225_v42 }
  0x76   :  { %487 = vmatprep.subr.bf16.mxu1 %v1228_v45  ;;  %953 = vmatpush1.bf16.msra.mxu0 %v1312_v15  ;;  %v1369_v15 = vld [vmem:[#allocation8 + $0x1f4] ss:$8 sps:$4 sm:$0xff]  }
  0x77   :  { %954 = vmatprep.subr.bf16.mxu0 %v1313_v16 }
  0x78   :  { %479 = vmatmul.mubr.bf16.vlgmr.msra.gmra.mrb[0].mxu1 %v1544_v48 }
  0x79   :  { %488 = vmatpush1.bf16.msra.mxu1 %v1226_v47  ;;  %519 = vmatprep.mubr.bf16.mxu1 %v1537_v14  ;;  %v1252_v14 = vld [vmem:[#allocation6 + $0x10c] ss:$16 sps:$4 sm:$0xff]  }
  0x7a   :  { %489 = vmatprep.subr.bf16.mxu1 %v1231_v49  ;;  %955 = vmatpush1.bf16.msra.mxu0 %v1315_v19 }
  0x7b   :  { %956 = vmatprep.subr.bf16.mxu0 %v1316_v33 }
  0x7d   :  { %490 = vmatpush1.bf16.msra.mxu1 %v1229_v52  ;;  %v1330_v52 = vld [vmem:[#allocation8 + $0x124] ss:$8 sps:$4 sm:$0xff]  }
  0x7e   :  { %491 = vmatprep.subr.bf16.mxu1 %v1234_v53  ;;  %957 = vmatpush1.bf16.msra.mxu0 %v1318_v34  ;;  %v1328_v53 = vld [vmem:[#allocation8 + $0x120] ss:$8 sps:$4 sm:$0xff]  }
  0x7f   :  { %958 = vmatprep.subr.bf16.mxu0 %v1319_v35 }
  0x81   :  { %492 = vmatpush1.bf16.msra.mxu1 %v1232_v56  ;;  %v1336_v56 = vld [vmem:[#allocation8 + $0x144] ss:$8 sps:$4 sm:$0xff]  }
  0x82   :  { %493 = vmatprep.subr.bf16.mxu1 %v1237_v57  ;;  %959 = vmatpush1.bf16.msra.mxu0 %v1321_v36  ;;  %v1334_v57 = vld [vmem:[#allocation8 + $0x140] ss:$8 sps:$4 sm:$0xff]  }
  0x83   :  { %969 = vmatprep.subr.bf16.mxu0 %v1324_v37 }
  0x85   :  { %494 = vmatpush1.bf16.msra.mxu1 %v1235_v60  ;;  %v1342_v60 = vld [vmem:[#allocation8 + $0x164] ss:$8 sps:$4 sm:$0xff]  }
  0x86   :  { %495 = vmatprep.subr.bf16.mxu1 %v1240_v61  ;;  %v1340_v61 = vld [vmem:[#allocation8 + $0x160] ss:$8 sps:$4 sm:$0xff]  }
  0x89   :  { %496 = vmatpush1.bf16.msra.mxu1 %v1238_v0  ;;  %v1348_v0 = vld [vmem:[#allocation8 + $0x184] ss:$8 sps:$4 sm:$0xff]  }
  0x8a   :  { %497 = vmatprep.subr.bf16.mxu1 %v1243_v1  ;;  %v1346_v1 = vld [vmem:[#allocation8 + $0x180] ss:$8 sps:$4 sm:$0xff]  }
  0x8d   :  { %498 = vmatpush1.bf16.msra.mxu1 %v1241_v4  ;;  %v1354_v4 = vld [vmem:[#allocation8 + $0x1a4] ss:$8 sps:$4 sm:$0xff]  }
  0x8e   :  { %499 = vmatprep.subr.bf16.mxu1 %v1246_v5  ;;  %v1352_v5 = vld [vmem:[#allocation8 + $0x1a0] ss:$8 sps:$4 sm:$0xff]  }
  0x91   :  { %500 = vmatpush1.bf16.msra.mxu1 %v1244_v8  ;;  %v1360_v8 = vld [vmem:[#allocation8 + $0x1c4] ss:$8 sps:$4 sm:$0xff]  }
  0x92   :  { %501 = vmatprep.subr.bf16.mxu1 %v1249_v9  ;;  %v1358_v9 = vld [vmem:[#allocation8 + $0x1c0] ss:$8 sps:$4 sm:$0xff]  }
  0x95   :  { %502 = vmatpush1.bf16.msra.mxu1 %v1247_v12  ;;  %v1366_v12 = vld [vmem:[#allocation8 + $0x1e4] ss:$8 sps:$4 sm:$0xff]  }
  0x96   :  { %503 = vmatprep.subr.bf16.mxu1 %v1252_v14  ;;  %v1364_v14 = vld [vmem:[#allocation8 + $0x1e0] ss:$8 sps:$4 sm:$0xff]  }
  0x99   :  { %504 = vmatpush1.bf16.msra.mxu1 %v1250_v17 }
  0x9a   :  { %505 = vmatprep.subr.bf16.mxu1 %v1255_v18 }
  0x9d   :  { %506 = vmatpush1.bf16.msra.mxu1 %v1253_v20 }
  0x9e   :  { %507 = vmatprep.subr.bf16.mxu1 %v1258_v21  ;;  %v1367_v21 = vld [vmem:[#allocation8 + $0x1f0] ss:$8 sps:$4 sm:$0xff]  }
  0xa1   :  { %508 = vmatpush1.bf16.msra.mxu1 %v1256_v22 }
  0xa2   :  { %509 = vmatprep.subr.bf16.mxu1 %v1261_v23 }
  0xa5   :  { %510 = vmatpush1.bf16.msra.mxu1 %v1259_v24 }
  0xa6   :  { %511 = vmatprep.subr.bf16.mxu1 %v1264_v25 }
  0xa9   :  { %512 = vmatpush1.bf16.msra.mxu1 %v1262_v26 }
  0xaa   :  { %513 = vmatprep.subr.bf16.mxu1 %v1267_v27  ;;  %v1011_v27 = vstv %s1566_s0 }
  0xad   :  { %514 = vmatpush1.bf16.msra.mxu1 %v1265_v28  ;;  %v1012_v28 = vmul.f32 %v1011_v27, %v1540_v43 }
  0xae   :  { %515 = vmatprep.subr.bf16.mxu1 %v1270_v29  ;;  %v1013_v29 = vmul.f32 %v1011_v27, %v1533_v13 }
  0xb1   :  { %516 = vmatpush1.bf16.msra.mxu1 %v1268_v30 }
  0xb2   :  { %517 = vmatprep.subr.bf16.mxu1 %v1273_v31 }
  0xb5   :  { %518 = vmatpush1.bf16.msra.mxu1 %v1271_v32 }
  0xb8   :  { %520 = vmatmul.mubr.bf16.vlgmr.msra.gmra.mrb[4].mxu1 %v1544_v48  ;;  %v1322_v48 = vld [vmem:[#allocation8 + $0x100] ss:$8 sps:$4 sm:$0xff]  }
 0x14b   :  { %v480_v38 = vpop.f32.mrb[0].mxu1 }
 0x14c   :  { %v1098_v39 = vclamps-f32 %v480_v38, 0.5  ;;  %v482_v40 = vpop.f32.mrb[1].mxu1 }
 0x14d   :  { %v1099_v41 = vclamps-f32 %v482_v40, 0.5  ;;  %v484_v42 = vpop.f32.mrb[2].mxu1 }
 0x14e   :  { %v536_v44 = vsub.f32 %v480_v38, %v1098_v39  ;;  %v485_v45 = vpop.f32.mrb[3].mxu1 }
 0x14f   :  { %v537_v46 = vsub.f32 %v482_v40, %v1099_v41 }
 0x150   :  { %v540_v49 = vpack.c.bf16 %v536_v44, %v536_v44 }
 0x151   :  { %v541_v47 = vpack.c.bf16 %v537_v46, %v537_v46 }
 0x153   :  { %960 = vmatprep.mubr.bf16.mxu0 %v541_v47 }
 0x154   :  { %961 = vmatmul.mubr.bf16.vlgmr.msra.gmra.mrb[0].mxu0 %v540_v49 }
 0x155   :  { %970 = vmatpush1.bf16.msra.mxu0 %v1322_v48 }
 0x156   :  { %971 = vmatprep.subr.bf16.mxu0 %v1327_v50 }
 0x159   :  { %972 = vmatpush1.bf16.msra.mxu0 %v1325_v51 }
 0x15a   :  { %973 = vmatprep.subr.bf16.mxu0 %v1330_v52 }
 0x15d   :  { %974 = vmatpush1.bf16.msra.mxu0 %v1328_v53 }
 0x15e   :  { %975 = vmatprep.subr.bf16.mxu0 %v1333_v54 }
 0x161   :  { %976 = vmatpush1.bf16.msra.mxu0 %v1331_v55 }
 0x162   :  { %977 = vmatprep.subr.bf16.mxu0 %v1336_v56 }
 0x165   :  { %978 = vmatpush1.bf16.msra.mxu0 %v1334_v57 }
 0x166   :  { %979 = vmatprep.subr.bf16.mxu0 %v1339_v58 }
 0x169   :  { %980 = vmatpush1.bf16.msra.mxu0 %v1337_v59 }
 0x16a   :  { %981 = vmatprep.subr.bf16.mxu0 %v1342_v60 }
 0x16d   :  { %982 = vmatpush1.bf16.msra.mxu0 %v1340_v61 }
 0x16e   :  { %983 = vmatprep.subr.bf16.mxu0 %v1345_v62 }
 0x171   :  { %984 = vmatpush1.bf16.msra.mxu0 %v1343_v63 }
 0x172   :  { %985 = vmatprep.subr.bf16.mxu0 %v1348_v0 }
 0x175   :  { %986 = vmatpush1.bf16.msra.mxu0 %v1346_v1 }
 0x176   :  { %987 = vmatprep.subr.bf16.mxu0 %v1351_v2 }
 0x179   :  { %988 = vmatpush1.bf16.msra.mxu0 %v1349_v3 }
 0x17a   :  { %989 = vmatprep.subr.bf16.mxu0 %v1354_v4 }
 0x17d   :  { %990 = vmatpush1.bf16.msra.mxu0 %v1352_v5 }
 0x17e   :  { %991 = vmatprep.subr.bf16.mxu0 %v1357_v6 }
 0x181   :  { %992 = vmatpush1.bf16.msra.mxu0 %v1355_v7 }
 0x182   :  { %993 = vmatprep.subr.bf16.mxu0 %v1360_v8 }
 0x185   :  { %994 = vmatpush1.bf16.msra.mxu0 %v1358_v9 }
 0x186   :  { %995 = vmatprep.subr.bf16.mxu0 %v1363_v10 }
 0x189   :  { %996 = vmatpush1.bf16.msra.mxu0 %v1361_v11 }
 0x18a   :  { %997 = vmatprep.subr.bf16.mxu0 %v1366_v12 }
 0x18b   :  { %v521_v16 = vpop.f32.mrb[4].mxu1 }
 0x18c   :  { %v1100_v17 = vclamps-f32 %v521_v16, 0.5  ;;  %v523_v18 = vpop.f32.mrb[5].mxu1 }
 0x18d   :  { %v1101_v19 = vclamps-f32 %v523_v18, 0.5  ;;  %v525_v20 = vpop.f32.mrb[6].mxu1  ;;  %998 = vmatpush1.bf16.msra.mxu0 %v1364_v14 }
 0x18e   :  { %v538_v22 = vsub.f32 %v521_v16, %v1100_v17  ;;  %v526_v23 = vpop.f32.mrb[7].mxu1  ;;  %999 = vmatprep.subr.bf16.mxu0 %v1369_v15 }
 0x18f   :  { %v539_v24 = vsub.f32 %v523_v18, %v1101_v19 }
 0x190   :  { %v542_v26 = vpack.c.bf16 %v538_v22, %v538_v22 }
 0x191   :  { %v543_v25 = vpack.c.bf16 %v539_v24, %v539_v24  ;;  %1000 = vmatpush1.bf16.msra.mxu0 %v1367_v21 }
 0x193   :  { %1001 = vmatprep.mubr.bf16.mxu0 %v543_v25 }
 0x194   :  { %1002 = vmatmul.mubr.bf16.vlgmr.msra.gmra.mrb[0].mxu0 %v542_v26 }
 0x267   :  { %v1003_v30 = vpop.f32.mrb[0].mxu0 }
 0x268   :  { %v1014_v31 = vsub.f32 %v1003_v30, %v1012_v28  ;;  %v1005_v32 = vpop.f32.mrb[1].mxu0 }
 0x269   :  { %v1015_v33 = vsub.f32 %v1005_v32, %v1013_v29  ;;  %v1007_v34 = vpop.f32.mrb[2].mxu0 }
 0x26a   :  { %1016 = vst [vmem:[#allocation9] sm:$0xff] %v1014_v31  ;;  %v1008_v35 = vpop.f32.mrb[3].mxu0 }
 0x26b   :  { %1017 = vst [vmem:[#allocation9 + $0x8] sm:$0xff] %v1015_v33 }
 0x26c   :  { %1447 = shalt.err (!%p1444_p0)
}
 0x26d   :  { %s1448_s6 = scalar_lea.hbm %s1570_s4, 256 }
 0x26e   :  { %p1449_p1 = scmp.ne.s32.totalorder %s1570_s4, %s1448_s6  ;;  %p1452_p2 = scmp.lt.u32.totalorder %s1448_s6, %s1570_s4 }
 0x270   :  { %p1454_p3 = pnand %p1452_p2, %p1449_p1 }
 0x272   :  { %1457 = shalt.err (!%p1454_p3)
}
 0x273   :  { %1027 = dma.vmem_to_hbm [thread:$0]  %s1025_s29, 256, %s1570_s4, [#allocation5]  }
 0x274   :  { %1462 = dma.done.wait [#allocation5], 256  }
 0x275   :  { %1463 = vsyncadd [#allocation5], 4294967040 }
 0x276   :  { %1031 = vsyncpa [#allocation4], 1 }
 0x277   :  { %1032 = vsyncpa [#allocation7], 1 }
 0x278   :  { %1033 = vsyncpa [#allocation5], 1 }

</bundles_post_ra>
